<compile_context>
chip_gen: v5e
topology: v5e:2x2
jax: 0.10.0
libtpu: 0.0.40
codegen_flags: <defaults>
</compile_context>

<pallas_src>
import functools
import math

import jax
import jax.numpy as jnp
from jax.experimental import pallas as pl
from jax.experimental.pallas import tpu as pltpu

_LANES = 128


def _jacobi_monomial_basis(filter_order, alpha, beta):
    """Monomial coefficients of the Jacobi basis P_0..P_k (pure Python floats).

    Returns a (k+1, k+1) list-of-lists B with B[i][m] = coefficient of x^m in
    P_i^{(alpha,beta)}(x), using exactly the recurrence from the PyTorch module
    (with the 1/a1 divide folded in as a compile-time constant).
    """
    k = filter_order
    K = k + 1
    basis = []
    p0 = [0.0] * K
    p0[0] = 1.0
    basis.append(p0)
    if k >= 1:
        # P_1 = 0.5*(2*(alpha+1) + (alpha+beta+2)*(x-1))
        p1 = [0.0] * K
        p1[0] = 0.5 * (2.0 * (alpha + 1.0) - (alpha + beta + 2.0))
        p1[1] = 0.5 * (alpha + beta + 2.0)
        basis.append(p1)
    for n in range(2, k + 1):
        a1 = 2.0 * n * (n + alpha + beta) * (2.0 * n + alpha + beta - 2.0)
        a2 = (2.0 * n + alpha + beta - 1.0) * (alpha ** 2 - beta ** 2)
        a3 = ((2.0 * n + alpha + beta - 2.0)
              * (2.0 * n + alpha + beta - 1.0)
              * (2.0 * n + alpha + beta))
        a4 = (2.0 * (n + alpha - 1.0) * (n + beta - 1.0)
              * (2.0 * n + alpha + beta))
        inv_a1 = 1.0 / a1
        p_curr, p_prev = basis[-1], basis[-2]
        p_next = [0.0] * K
        for m in range(K):
            val = a2 * p_curr[m] - a4 * p_prev[m]
            if m >= 1:
                val += a3 * p_curr[m - 1]
            p_next[m] = val * inv_a1
        basis.append(p_next)
    return basis


def _binomial_shift_matrix(filter_order):
    """S[m][j] = C(m, j) * (-1)^(m-j): coefficients of (y - 1)^m in powers of y."""
    k = filter_order
    S = [[0.0] * (k + 1) for _ in range(k + 1)]
    for m in range(k + 1):
        for j in range(m + 1):
            S[m][j] = float(math.comb(m, j)) * ((-1.0) ** (m - j))
    return S


def _spectral_filter_kernel(mono_ref, ev_ref, out_ref, *, filter_order):
    """Per-tile body: Horner-form polynomial directly in ev, then exp(-|.|)+1e-6."""
    # Hoist SMEM scalar reads out of the vector work.
    mono = [mono_ref[i] for i in range(filter_order + 1)]
    x = ev_ref[...]
    if filter_order == 0:
        result = jnp.zeros_like(x) + mono[0]
    else:
        result = x * mono[filter_order] + mono[filter_order - 1]
        for m in range(filter_order - 2, -1, -1):
            result = result * x + mono[m]
    out_ref[...] = jnp.exp(-jnp.abs(result)) + 1e-6


def _pick_block_rows(rows, max_block_rows, min_steps=8):
    """Sublane-aligned block height: big enough to amortize ~0.35us/step overhead,
    small enough to keep >= min_steps grid steps (v7x megacore) when possible."""
    max_block_rows = max(8, (max_block_rows // 8) * 8)     # defensive 8-alignment
    if rows <= max_block_rows:
        per_step = -(-rows // min_steps)
        block_rows = max(256, -(-per_step // 8) * 8)
        block_rows = min(block_rows, max_block_rows)
    else:
        block_rows = max_block_rows
    # Never larger than the array itself (block == full dim is always legal).
    return min(block_rows, rows)


@functools.partial(
    jax.jit,
    static_argnames=("filter_order", "alpha", "beta", "max_block_rows"))
def universal_spectral_filter(eigenvalues, coeffs, *,
                              filter_order=3, alpha=0.5, beta=0.5,
                              max_block_rows=2048):
    """eigenvalues: (N,) float; coeffs: (filter_order+1,) float. Returns (N,) f32."""
    eigenvalues = eigenvalues.astype(jnp.float32)
    coeffs = coeffs.astype(jnp.float32)
    n = eigenvalues.shape[0]
    k = filter_order

    # ---- scalar prep (tiny; fused by jit) -----------------------------------
    # Global reduction hoisted out of the kernel (exact under tiling).
    scale = 2.0 / (jnp.max(eigenvalues) + 1e-8)

    # Fold the (compile-time) Jacobi recurrence with the learnable coeffs into
    # monomial coefficients of the filter polynomial in x = scale*ev - 1 ...
    basis_mat = jnp.asarray(_jacobi_monomial_basis(k, alpha, beta),
                            dtype=jnp.float32)            # (k+1, k+1)
    mono_x = coeffs @ basis_mat                           # coeffs of x^m
    # ... then binomial-shift and scale so the kernel Horners directly on ev:
    #   poly(x) = poly(scale*ev - 1) = sum_j mono_ev[j] * ev^j
    shift_mat = jnp.asarray(_binomial_shift_matrix(k), dtype=jnp.float32)
    mono_ev = (mono_x @ shift_mat) * scale ** jnp.arange(k + 1, dtype=jnp.float32)

    # ---- tiling -------------------------------------------------------------
    rows = -(-n // _LANES)
    pad = rows * _LANES - n
    ev_flat = jnp.pad(eigenvalues, (0, pad)) if pad else eigenvalues
    ev2d = ev_flat.reshape(rows, _LANES)      # free bitcast when pad == 0

    block_rows = _pick_block_rows(rows, max_block_rows)
    grid = (pl.cdiv(rows, block_rows),)       # ragged tail -> masked partial block

    cp_kwargs = dict(dimension_semantics=("parallel",))
    # Only needed if a caller raises the cap past v5e's 16 MiB default scope.
    vmem_bytes = 4 * block_rows * _LANES * 4  # 2x double-buffered in + out, f32
    if vmem_bytes > (12 << 20):
        cp_kwargs["vmem_limit_bytes"] = min(vmem_bytes + (4 << 20), 64 << 20)

    kernel = functools.partial(_spectral_filter_kernel, filter_order=k)

    out2d = pl.pallas_call(
        kernel,
        out_shape=jax.ShapeDtypeStruct((rows, _LANES), jnp.float32),
        grid=grid,
        in_specs=[
            pl.BlockSpec(memory_space=pltpu.MemorySpace.SMEM),      # folded coeffs
            pl.BlockSpec((block_rows, _LANES), lambda i: (i, 0)),   # eigenvalues
        ],
        out_specs=pl.BlockSpec((block_rows, _LANES), lambda i: (i, 0)),
        compiler_params=pltpu.CompilerParams(**cp_kwargs),
    )(mono_ev, ev2d)

    out = out2d.reshape(rows * _LANES)
    return out[:n] if pad else out


def _reference(eigenvalues, coeffs, filter_order=3, alpha=0.5, beta=0.5):
    """Pure-JAX reference mirroring the PyTorch forward (Jacobi recurrence)."""
    eigenvalues = eigenvalues.astype(jnp.float32)
    max_ev = jnp.max(eigenvalues) + 1e-8
    x = 2.0 * (eigenvalues / max_ev) - 1.0
    basis = [jnp.ones_like(x)]
    if filter_order >= 1:
        basis.append(0.5 * (2.0 * (alpha + 1.0) + (alpha + beta + 2.0) * (x - 1.0)))
    for nn in range(2, filter_order + 1):
        a1 = 2.0 * nn * (nn + alpha + beta) * (2.0 * nn + alpha + beta - 2.0)
        a2 = (2.0 * nn + alpha + beta - 1.0) * (alpha ** 2 - beta ** 2)
        a3 = ((2.0 * nn + alpha + beta - 2.0) * (2.0 * nn + alpha + beta - 1.0)
              * (2.0 * nn + alpha + beta))
        a4 = 2.0 * (nn + alpha - 1.0) * (nn + beta - 1.0) * (2.0 * nn + alpha + beta)
        basis.append(((a2 + a3 * x) * basis[-1] - a4 * basis[-2]) / a1)
    result = sum(coeffs[i] * basis[i] for i in range(filter_order + 1))
    return jnp.exp(-jnp.abs(result)) + 1e-6


if __name__ == "__main__":
    filter_order = 3
    alpha, beta = 0.5, 0.5

    # Deterministic parameter init, matching the module's __init__.
    smooth_lowpass = [1.0, -0.5, 0.1, -0.02, 0.004, -0.0008, 0.00015, -3e-05]
    coeffs = jnp.array(smooth_lowpass[:filter_order + 1], dtype=jnp.float32)

    key = jax.random.PRNGKey(0)

    # Lane-aligned spectrum (fast path: no pad, no tail slice).
    eigenvalues = jax.random.uniform(key, (512,), dtype=jnp.float32) * 2.0
    out = jax.block_until_ready(
        universal_spectral_filter(eigenvalues, coeffs,
                                  filter_order=filter_order,
                                  alpha=alpha, beta=beta))
    ref = _reference(eigenvalues, coeffs, filter_order, alpha, beta)
    assert out.shape == eigenvalues.shape
    assert jnp.allclose(out, ref, atol=1e-5, rtol=1e-5)

    # Ragged size exercises the lane-pad + tail-slice path.
    key2 = jax.random.PRNGKey(1)
    ev2 = jax.random.uniform(key2, (1000,), dtype=jnp.float32) * 2.0
    out2 = jax.block_until_ready(
        universal_spectral_filter(ev2, coeffs, filter_order=filter_order,
                                  alpha=alpha, beta=beta))
    ref2 = _reference(ev2, coeffs, filter_order, alpha, beta)
    assert out2.shape == ev2.shape
    assert jnp.allclose(out2, ref2, atol=1e-5, rtol=1e-5)

    # Multi-block case exercising the parallel grid and a partial last row-block.
    key3 = jax.random.PRNGKey(2)
    ev3 = jax.random.uniform(key3, (70_000,), dtype=jnp.float32) * 3.0
    out3 = jax.block_until_ready(
        universal_spectral_filter(ev3, coeffs, filter_order=filter_order,
                                  alpha=alpha, beta=beta))
    ref3 = _reference(ev3, coeffs, filter_order, alpha, beta)
    assert out3.shape == ev3.shape
    assert jnp.allclose(out3, ref3, atol=1e-5, rtol=1e-5)

    print("KERNEL_OK")
</pallas_src>

<mosaic_0001>
module attributes {stable_mosaic.version = 11 : i64} {
  func.func @_spectral_filter_kernel(%arg0: i32, %arg1: memref<4xf32, #tpu.memory_space<smem>>, %arg2: memref<4x128xf32, #tpu.memory_space<vmem>>, %arg3: memref<4x128xf32, #tpu.memory_space<vmem>>) attributes {dimension_semantics = [#tpu.dimension_semantics<parallel>], iteration_bounds = array<i64: 1>, scalar_prefetch = 0 : i64, scratch_operands = 0 : i64, tpu.core_type = #tpu.core_type<tc>, window_params = [{transform_indices = @transform_0, window_bounds = array<i64: 4>}, {transform_indices = @transform_1, window_bounds = array<i64: 4, 128>}, {transform_indices = @transform_2, window_bounds = array<i64: 4, 128>}]} {
    %c0 = arith.constant 0 : index
    %0 = memref.load %arg1[%c0] : memref<4xf32, #tpu.memory_space<smem>>
    %c1 = arith.constant 1 : index
    %1 = memref.load %arg1[%c1] : memref<4xf32, #tpu.memory_space<smem>>
    %c2 = arith.constant 2 : index
    %2 = memref.load %arg1[%c2] : memref<4xf32, #tpu.memory_space<smem>>
    %c3 = arith.constant 3 : index
    %3 = memref.load %arg1[%c3] : memref<4xf32, #tpu.memory_space<smem>>
    %c0_0 = arith.constant 0 : index
    %c0_1 = arith.constant 0 : index
    %4 = vector.load %arg2[%c0_0, %c0_1] : memref<4x128xf32, #tpu.memory_space<vmem>>, vector<4x128xf32>
    %5 = vector.broadcast %3 : f32 to vector<4x128xf32>
    %6 = arith.mulf %4, %5 : vector<4x128xf32>
    %7 = vector.broadcast %2 : f32 to vector<4x128xf32>
    %8 = arith.addf %6, %7 : vector<4x128xf32>
    %9 = arith.mulf %8, %4 : vector<4x128xf32>
    %10 = vector.broadcast %1 : f32 to vector<4x128xf32>
    %11 = arith.addf %9, %10 : vector<4x128xf32>
    %12 = arith.mulf %11, %4 : vector<4x128xf32>
    %13 = vector.broadcast %0 : f32 to vector<4x128xf32>
    %14 = arith.addf %12, %13 : vector<4x128xf32>
    %15 = math.absf %14 : vector<4x128xf32>
    %cst = arith.constant 0.000000e+00 : f32
    %16 = vector.broadcast %cst : f32 to vector<4x128xf32>
    %17 = arith.subf %16, %15 : vector<4x128xf32>
    %18 = math.exp %17 : vector<4x128xf32>
    %cst_2 = arith.constant 9.99999997E-7 : f32
    %19 = vector.broadcast %cst_2 : f32 to vector<4x128xf32>
    %20 = arith.addf %18, %19 : vector<4x128xf32>
    %c0_3 = arith.constant 0 : index
    %c0_4 = arith.constant 0 : index
    %21 = vector.load %arg3[%c0_3, %c0_4] : memref<4x128xf32, #tpu.memory_space<vmem>>, vector<4x128xf32>
    tpu.vector_store %arg3[%c0_3, %c0_4], %20 {strides = array<i32>} : memref<4x128xf32, #tpu.memory_space<vmem>>, vector<4x128xf32>,
    return
  }
  func.func @transform_0(%arg0: i32) -> i32 {
    %c0_i32 = arith.constant 0 : i32
    %c0_i32_0 = arith.constant 0 : i32
    return %c0_i32 : i32
  }
  func.func @transform_1(%arg0: i32) -> (i32, i32) {
    %c0_i32 = arith.constant 0 : i32
    %c0_i32_0 = arith.constant 0 : i32
    return %arg0, %c0_i32 : i32, i32
  }
  func.func @transform_2(%arg0: i32) -> (i32, i32) {
    %c0_i32 = arith.constant 0 : i32
    %c0_i32_0 = arith.constant 0 : i32
    return %arg0, %c0_i32 : i32, i32
  }
}

</mosaic_0001>

<bundles_post_ra>
// kernel: universal_spectral_filter.1
= control target key start
LH: loop header
LB: loop body
LE: loop exit
PB: predicated region body
PF: predicated region fallthrough
CT: control target
= control target key end

     0   :  { %7 = vsyncpa [#allocation4], 0  ;;  %s136_s0 = inlined_call_operand.vmem [shape: f32[4], index: 0, kind: input, shape index: {}]   ;;  %s137_s1 = inlined_call_operand.vmem [shape: f32[4,128], index: 1, kind: input, shape index: {}]   ;;  %s138_s2 = inlined_call_operand.hbm [shape: f32[4,128], index: 2, kind: output, shape index: {}]  }
   0x1   :  { %8 = vsyncpa [#allocation3], 0  ;;  %s14_s11 = sshll.u32 %s136_s0, 4  ;;  %s110_s12 = smov [#allocation2]   ;;  %s15_s11 = int_to_ptr.vmem [resolvable:$true] %s14_s11 }
   0x2   :  { %17 = dma.vmem_to_smem %s15_s11, 16, %s110_s12, [#allocation4]  }
   0x3   :  { %106 = dma.done.wait [#allocation4], 16  }
   0x4   :  { %107 = vsyncadd [#allocation4], 4294967280 }
   0x5   :  { %24 = sfence }
   0x6   :  { %s64_s13 = sld [smem:[#allocation2 + $0x2]]  ;;  %v29_v0 = vld [vmem:[%s137_s1] sm:$0xf]  ;;  %s111_s0 = smov [#allocation5]  }
   0x7   :  { %s65_s14 = sld [smem:[#allocation2 + $0x3]]  ;;  %s51_s19 = sshll.u32 %s111_s0, 4  ;;  %s52_s19 = int_to_ptr.vmem [resolvable:$true] %s51_s19 }
   0x8   :  { %s63_s15 = sld [smem:[#allocation2 + $0x1]]  ;;  %s53_s1 = sshll.u32 %s138_s2, 4  ;;  %s54_s1 = int_to_ptr.hbm [resolvable:$true] %s53_s1 }
   0x9   :  { %s25_s18 = sld [smem:[#allocation2]] }
   0xc   :  { %v32_v2 = vstv %s64_s13 }
   0xd   :  { %v30_v1 = vstv %s65_s14 }
   0xe   :  { %v31_v3 = vmul.f32 %v30_v1, %v29_v0  ;;  %v35_v5 = vstv %s63_s15 }
   0xf   :  { %v38_v8 = vstv %s25_s18 }
  0x10   :  { %v33_v4 = vadd.f32 %v32_v2, %v31_v3 }
  0x12   :  { %v34_v6 = vmul.f32 %v33_v4, %v29_v0 }
  0x14   :  { %v36_v7 = vadd.f32 %v35_v5, %v34_v6 }
  0x16   :  { %v37_v9 = vmul.f32 %v36_v7, %v29_v0 }
  0x18   :  { %v39_v10 = vadd.f32 %v38_v8, %v37_v9 }
  0x1a   :  { %v40_v11 = vand.u32 2147483647, %v39_v10 }
  0x1c   :  { %v41_v12 = vsub.f32 0.0, %v40_v11 }
  0x1e   :  { %v42_v13 = vmul.f32 1.442695, %v41_v12 }
  0x20   :  { %68 = vpow2.f32 %v42_v13 }
  0x26   :  { %v69_v14 = vpop.eup %68 }
  0x27   :  { %v44_v15 = vadd.f32 1e-06, %v69_v14 }
  0x29   :  { %45 = vst [vmem:[#allocation5] sm:$0xf] %v44_v15 }
  0x2a   :  { %56 = dma.vmem_to_hbm [thread:$0]  %s52_s19, 64, %s54_s1, [#allocation3]  }
  0x2b   :  { %108 = dma.done.wait [#allocation3], 64  }
  0x2c   :  { %109 = vsyncadd [#allocation3], 4294967232 }
  0x2d   :  { %61 = vsyncpa [#allocation3], 1 }
  0x2e   :  { %62 = vsyncpa [#allocation4], 1 }

</bundles_post_ra>
